<compile_context>
chip_gen: v7x
topology: tpu7x:2x2x1
jax: 0.10.0
libtpu: 0.0.40
codegen_flags: <defaults>
</compile_context>

<pallas_src>
import jax
import jax.numpy as jnp
from jax.experimental import pallas as pl
from jax.experimental.pallas import tpu as pltpu

NUM_DIM = 8          # hard-coded in EmbeddingNet.forward
HIDDEN = 1000        # context_layer hidden width (nn.Linear(num_dim, 1000))
HIDDEN_PAD = 1024    # 8 * 128: dense lanes, unmasked vregs, clean MXU tiling
OUT_PAD = 128        # lane-dense output (real outputs live in columns [:8])


def _round_up(x, m):
    return ((x + m - 1) // m) * m


def embedding_net_kernel(x_ref, w1_ref, b1_ref, w2_ref, b2_ref, out_ref):
    """Fused context-layer forward for one batch tile.

    x_ref  : (TB, CD)              f32   raw flattened input tile
    w1_ref : (CD, HIDDEN_PAD)      bf16  rep-net folded into context_layer[0]
    b1_ref : (1, HIDDEN_PAD)       f32
    w2_ref : (HIDDEN_PAD, OUT_PAD) bf16  context_layer[2].weight.T (zero-padded)
    b2_ref : (1, OUT_PAD)          f32
    out_ref: (TB, OUT_PAD)         f32
    """
    x = x_ref[...].astype(w1_ref.dtype)                    # cast in-kernel (no wrapper pass)
    h = jnp.dot(x, w1_ref[...], preferred_element_type=jnp.float32)
    h = jnp.maximum(h + b1_ref[...], 0.0)                  # bias + ReLU in f32 (v5e-safe)
    out = jnp.dot(h.astype(w2_ref.dtype), w2_ref[...],
                  preferred_element_type=jnp.float32) + b2_ref[...]
    out_ref[...] = out


def prepare_params(params, in_features, weight_dtype=jnp.bfloat16):
    """Fold rep-net into context_layer[0], pad to TPU-friendly shapes, cast weights."""
    wr, br, w1, b1, w2, b2 = params     # all float32

    # Exact fold (no nonlinearity between the two linears):
    #   (x @ wr + br) @ w1 + b1 == x @ (wr @ w1) + (br @ w1 + b1)
    w_fused = wr @ w1                   # (C*D, HIDDEN)
    b_fused = br @ w1 + b1              # (1, HIDDEN)

    # Zero padding is exact: padded hidden rows of w2 are zero so padded hidden
    # units contribute nothing; padded output columns are zero and sliced off.
    w_fused = jnp.pad(w_fused, ((0, 0), (0, HIDDEN_PAD - HIDDEN)))
    b_fused = jnp.pad(b_fused, ((0, 0), (0, HIDDEN_PAD - HIDDEN)))
    w2p = jnp.pad(w2, ((0, HIDDEN_PAD - HIDDEN), (0, OUT_PAD - NUM_DIM)))
    b2p = jnp.pad(b2, ((0, 0), (0, OUT_PAD - NUM_DIM)))

    return (w_fused.astype(weight_dtype),
            b_fused.astype(jnp.float32),
            w2p.astype(weight_dtype),
            b2p.astype(jnp.float32))


def _choose_batch_tile(B, batch_tile):
    """Pick a batch tile: amortize grid-step overhead, avoid large pad waste,
    and keep >= 2 grid steps when possible so v7x's two TCs both get work."""
    b8 = _round_up(max(B, 1), 8)
    tb = min(batch_tile, b8)
    if b8 // tb < 2 and b8 >= 16:       # force >= 2 grid steps (megacore on v7x)
        tb = _round_up((b8 + 1) // 2, 8)
    return tb


def embedding_net_forward(x, prepared, batch_tile=2048):
    """x: (B, C, D) float32.  Returns (B, NUM_DIM) float32."""
    w1, b1, w2, b2 = prepared
    B, C, D = x.shape
    cd = C * D

    tb = _choose_batch_tile(B, batch_tile)
    b_pad = _round_up(B, tb)

    x_flat = x.reshape(B, cd)                               # f32, no cast/pad here
    if b_pad != B:
        x_flat = jnp.pad(x_flat, ((0, b_pad - B), (0, 0)))

    out = pl.pallas_call(
        embedding_net_kernel,
        out_shape=jax.ShapeDtypeStruct((b_pad, OUT_PAD), jnp.float32),
        grid=(b_pad // tb,),
        in_specs=[
            pl.BlockSpec((tb, cd), lambda i: (i, 0)),            # stream f32 x tiles
            pl.BlockSpec((cd, HIDDEN_PAD), lambda i: (0, 0)),    # resident weights
            pl.BlockSpec((1, HIDDEN_PAD), lambda i: (0, 0)),
            pl.BlockSpec((HIDDEN_PAD, OUT_PAD), lambda i: (0, 0)),
            pl.BlockSpec((1, OUT_PAD), lambda i: (0, 0)),
        ],
        out_specs=pl.BlockSpec((tb, OUT_PAD), lambda i: (i, 0)),  # lane-dense output
        compiler_params=pltpu.CompilerParams(
            dimension_semantics=("parallel",)),   # batch axis -> megacore on v7x
    )(x_flat, w1, b1, w2, b2)
    return out[:B, :NUM_DIM]


def init_params(key, in_features):
    """Deterministic parameter init (PyTorch-Linear-style uniform bounds), float32."""
    ks = jax.random.split(key, 6)

    def lin(kw, kb, fan_in, fan_out):
        bound = 1.0 / jnp.sqrt(fan_in)
        w = jax.random.uniform(kw, (fan_in, fan_out), jnp.float32, -bound, bound)
        b = jax.random.uniform(kb, (1, fan_out), jnp.float32, -bound, bound)
        return w, b

    wr, br = lin(ks[0], ks[1], in_features, NUM_DIM)     # rep-net stand-in
    w1, b1 = lin(ks[2], ks[3], NUM_DIM, HIDDEN)          # context_layer[0]
    w2, b2 = lin(ks[4], ks[5], HIDDEN, NUM_DIM)          # context_layer[2]
    return (wr, br, w1, b1, w2, b2)


if __name__ == "__main__":
    key = jax.random.PRNGKey(0)
    k_x, k_p = jax.random.split(key)

    # Small shapes consistent with forward(): x of shape (batch, channels, dims)
    B, C, D = 2, 4, 16
    x = jax.random.normal(k_x, (B, C, D), dtype=jnp.float32)

    params = init_params(k_p, C * D)
    prepared = prepare_params(params, C * D)

    out = embedding_net_forward(x, prepared)
    out = jax.block_until_ready(out)
    assert out.shape == (B, NUM_DIM)

    # Reference 1 (tight): identical fused/padded/bf16 math in plain JAX.
    w1p, b1p, w2p, b2p = prepared
    xf = x.reshape(B, C * D).astype(w1p.dtype)
    h = jnp.maximum(jnp.dot(xf, w1p, preferred_element_type=jnp.float32) + b1p, 0.0)
    ref_fused = (jnp.dot(h.astype(w2p.dtype), w2p,
                         preferred_element_type=jnp.float32) + b2p)[:, :NUM_DIM]
    assert jnp.allclose(out, ref_fused, atol=1e-2, rtol=1e-2)

    # Reference 2 (loose): original unfused float32 module math; differences come
    # only from the exact algebraic fold rounding + bf16 weight/activation storage.
    wr, br, w1, b1, w2, b2 = params
    rep = x.reshape(B, C * D) @ wr + br
    ref_full = jnp.maximum(rep @ w1 + b1, 0.0) @ w2 + b2
    assert jnp.allclose(out, ref_full, atol=5e-2, rtol=5e-2)

    print("KERNEL_OK")
</pallas_src>

<mosaic_0001>
module attributes {stable_mosaic.version = 11 : i64} {
  func.func @embedding_net_kernel(%arg0: i32, %arg1: memref<8x64xf32, #tpu.memory_space<vmem>>, %arg2: memref<64x1024xbf16, #tpu.memory_space<vmem>>, %arg3: memref<1x1024xf32, #tpu.memory_space<vmem>>, %arg4: memref<1024x128xbf16, #tpu.memory_space<vmem>>, %arg5: memref<1x128xf32, #tpu.memory_space<vmem>>, %arg6: memref<8x128xf32, #tpu.memory_space<vmem>>) attributes {dimension_semantics = [#tpu.dimension_semantics<parallel>], iteration_bounds = array<i64: 1>, scalar_prefetch = 0 : i64, scratch_operands = 0 : i64, tpu.core_type = #tpu.core_type<tc>, window_params = [{transform_indices = @transform_0, window_bounds = array<i64: 8, 64>}, {pipeline_mode = #tpu.pipeline_mode<synchronous>, transform_indices = @transform_1, window_bounds = array<i64: 64, 1024>}, {pipeline_mode = #tpu.pipeline_mode<synchronous>, transform_indices = @transform_2, window_bounds = array<i64: 1, 1024>}, {pipeline_mode = #tpu.pipeline_mode<synchronous>, transform_indices = @transform_3, window_bounds = array<i64: 1024, 128>}, {pipeline_mode = #tpu.pipeline_mode<synchronous>, transform_indices = @transform_4, window_bounds = array<i64: 1, 128>}, {transform_indices = @transform_5, window_bounds = array<i64: 8, 128>}]} {
    %c0 = arith.constant 0 : index
    %c0_0 = arith.constant 0 : index
    %0 = vector.load %arg1[%c0, %c0_0] : memref<8x64xf32, #tpu.memory_space<vmem>>, vector<8x64xf32>
    %1 = arith.truncf %0 : vector<8x64xf32> to vector<8x64xbf16>
    %c0_1 = arith.constant 0 : index
    %c0_2 = arith.constant 0 : index
    %2 = vector.load %arg2[%c0_1, %c0_2] : memref<64x1024xbf16, #tpu.memory_space<vmem>>, vector<64x1024xbf16>
    %cst = arith.constant dense<0.000000e+00> : vector<8x1024xf32>
    %3 = tpu.matmul %1, %2, %cst {dimension_numbers = #tpu.dot_dimension_numbers<[1], [0], [0], [1], [0, 0, 1, 1], [], []>} : vector<8x64xbf16>, vector<64x1024xbf16>, vector<8x1024xf32> -> vector<8x1024xf32>
    %c0_3 = arith.constant 0 : index
    %c0_4 = arith.constant 0 : index
    %4 = vector.load %arg3[%c0_3, %c0_4] : memref<1x1024xf32, #tpu.memory_space<vmem>>, vector<1x1024xf32>
    %5 = vector.broadcast %4 : vector<1x1024xf32> to vector<8x1024xf32>
    %6 = arith.addf %3, %5 : vector<8x1024xf32>
    %cst_5 = arith.constant 0.000000e+00 : f32
    %7 = vector.broadcast %cst_5 : f32 to vector<8x1024xf32>
    %8 = arith.maximumf %6, %7 : vector<8x1024xf32>
    %9 = arith.truncf %8 : vector<8x1024xf32> to vector<8x1024xbf16>
    %c0_6 = arith.constant 0 : index
    %c0_7 = arith.constant 0 : index
    %10 = vector.load %arg4[%c0_6, %c0_7] : memref<1024x128xbf16, #tpu.memory_space<vmem>>, vector<1024x128xbf16>
    %cst_8 = arith.constant dense<0.000000e+00> : vector<8x128xf32>
    %11 = tpu.matmul %9, %10, %cst_8 {dimension_numbers = #tpu.dot_dimension_numbers<[1], [0], [0], [1], [0, 0, 1, 1], [], []>} : vector<8x1024xbf16>, vector<1024x128xbf16>, vector<8x128xf32> -> vector<8x128xf32>
    %c0_9 = arith.constant 0 : index
    %c0_10 = arith.constant 0 : index
    %12 = vector.load %arg5[%c0_9, %c0_10] : memref<1x128xf32, #tpu.memory_space<vmem>>, vector<1x128xf32>
    %13 = vector.broadcast %12 : vector<1x128xf32> to vector<8x128xf32>
    %14 = arith.addf %11, %13 : vector<8x128xf32>
    %c0_11 = arith.constant 0 : index
    %c0_12 = arith.constant 0 : index
    %15 = vector.load %arg6[%c0_11, %c0_12] : memref<8x128xf32, #tpu.memory_space<vmem>>, vector<8x128xf32>
    tpu.vector_store %arg6[%c0_11, %c0_12], %14 {strides = array<i32>} : memref<8x128xf32, #tpu.memory_space<vmem>>, vector<8x128xf32>,
    return
  }
  func.func @transform_0(%arg0: i32) -> (i32, i32) {
    %c0_i32 = arith.constant 0 : i32
    %c0_i32_0 = arith.constant 0 : i32
    return %arg0, %c0_i32 : i32, i32
  }
  func.func @transform_1(%arg0: i32) -> (i32, i32) {
    %c0_i32 = arith.constant 0 : i32
    %c0_i32_0 = arith.constant 0 : i32
    %c0_i32_1 = arith.constant 0 : i32
    return %c0_i32, %c0_i32_0 : i32, i32
  }
  func.func @transform_2(%arg0: i32) -> (i32, i32) {
    %c0_i32 = arith.constant 0 : i32
    %c0_i32_0 = arith.constant 0 : i32
    %c0_i32_1 = arith.constant 0 : i32
    return %c0_i32, %c0_i32_0 : i32, i32
  }
  func.func @transform_3(%arg0: i32) -> (i32, i32) {
    %c0_i32 = arith.constant 0 : i32
    %c0_i32_0 = arith.constant 0 : i32
    %c0_i32_1 = arith.constant 0 : i32
    return %c0_i32, %c0_i32_0 : i32, i32
  }
  func.func @transform_4(%arg0: i32) -> (i32, i32) {
    %c0_i32 = arith.constant 0 : i32
    %c0_i32_0 = arith.constant 0 : i32
    %c0_i32_1 = arith.constant 0 : i32
    return %c0_i32, %c0_i32_0 : i32, i32
  }
  func.func @transform_5(%arg0: i32) -> (i32, i32) {
    %c0_i32 = arith.constant 0 : i32
    %c0_i32_0 = arith.constant 0 : i32
    return %arg0, %c0_i32 : i32, i32
  }
}

</mosaic_0001>

<bundles_post_ra>
// kernel: tpu_custom_call.1
= control target key start
LH: loop header
LB: loop body
LE: loop exit
PB: predicated region body
PF: predicated region fallthrough
CT: control target
= control target key end

     0   :  { %10 = vsyncpa [#allocation3], 0  ;;  %s1702_s0 = inlined_call_operand.hbm [shape: f32[8,64], index: 0, kind: input, shape index: {}]   ;;  %s1703_s1 = inlined_call_operand.hbm [shape: bf16[64,1024], index: 1, kind: input, shape index: {}]   ;;  %s1704_s2 = inlined_call_operand.hbm [shape: f32[1,1024], index: 2, kind: input, shape index: {}]   ;;  %s1705_s3 = inlined_call_operand.hbm [shape: bf16[1024,128], index: 3, kind: input, shape index: {}]   ;;  %s1706_s4 = inlined_call_operand.vmem [shape: f32[1,128], index: 4, kind: input, shape index: {}]   ;;  %s1707_s5 = inlined_call_operand.hbm [shape: f32[8,128], index: 5, kind: output, shape index: {}]  }
   0x1   :  { %11 = vsyncpa [#allocation6], 0 }
   0x2   :  { %12 = vsyncpa [#allocation9], 0 }
   0x3   :  { %13 = vsyncpa [#allocation4], 0  ;;  %s1571_s18 = smov [#allocation5]   ;;  %s1453_s22 = scalar_lea.hbm %s1703_s1, 4096 }
   0x4   :  { %s29_s19 = sshll.u32 %s1571_s18, 4  ;;  %p1454_p0 = scmp.ne.s32.totalorder %s1703_s1, %s1453_s22  ;;  %s30_s19 = int_to_ptr.vmem [resolvable:$true] %s29_s19 }
   0x5   :  { %p1457_p1 = scmp.lt.u32.totalorder %s1453_s22, %s1703_s1 }
   0x7   :  { %p1459_p2 = pnand %p1457_p1, %p1454_p0 }
   0x9   :  { %1462 = shalt.err (!%p1459_p2)
}
   0xa   :  { %s1463_s27 = scalar_lea.vmem %s30_s19, 4096  ;;  %p1468_p4 = scmp.lt.s32.totalorder %s30_s19, %s30_s19 }
   0xb   :  { %p1464_p3 = scmp.ne.s32.totalorder %s30_s19, %s1463_s27  ;;  %p1469_p5 = scmp.lt.s32.totalorder %s1463_s27, %s1463_s27 }
   0xd   :  { %p1470_p6 = por %p1469_p5, %p1468_p4 }
   0xf   :  { %p1471_p7 = pnand %p1470_p6, %p1464_p3 }
  0x11   :  { %1474 = shalt.err (!%p1471_p7)
}
  0x12   :  { %s1572_s28 = smov 512   ;;  %s1573_s29 = smov 32  }
  0x13   :  { %35 = dma.hbm_to_vmem [thread:$0]  %s1703_s1, 4096, %s30_s19, [#allocation6], %s1572_s28, %s1572_s28, %s1573_s29  }
  0x14   :  { %s1574_s7 = smov [#allocation2]   ;;  %s1575_s9 = smov [#allocation7]  }
  0x15   :  { %s20_s8 = sshll.u32 %s1574_s7, 4  ;;  %s42_s10 = sshll.u32 %s1575_s9, 4  ;;  %s21_s8 = int_to_ptr.vmem [resolvable:$true] %s20_s8  ;;  %s43_s10 = int_to_ptr.vmem [resolvable:$true] %s42_s10 }
  0x16   :  { %s1475_s13 = scalar_lea.hbm %s1702_s0, 128 }
  0x17   :  { %p1476_p8 = scmp.ne.s32.totalorder %s1702_s0, %s1475_s13  ;;  %p1479_p9 = scmp.lt.u32.totalorder %s1475_s13, %s1702_s0 }
  0x19   :  { %p1481_p10 = pnand %p1479_p9, %p1476_p8 }
  0x1b   :  { %1484 = shalt.err (!%p1481_p10)
}
  0x1c   :  { %s1485_s1 = scalar_lea.vmem %s21_s8, 128  ;;  %p1490_p12 = scmp.lt.s32.totalorder %s21_s8, %s21_s8 }
  0x1d   :  { %p1486_p11 = scmp.ne.s32.totalorder %s21_s8, %s1485_s1  ;;  %p1491_p13 = scmp.lt.s32.totalorder %s1485_s1, %s1485_s1 }
  0x1f   :  { %p1492_p0 = por %p1491_p13, %p1490_p12 }
  0x21   :  { %p1493_p1 = pnand %p1492_p0, %p1486_p11 }
  0x23   :  { %1496 = shalt.err (!%p1493_p1)
}
  0x24   :  { %23 = dma.hbm_to_vmem [thread:$0]  %s1702_s0, 128, %s21_s8, [#allocation3]  }
  0x25   :  { %s1497_s22 = scalar_lea.hbm %s1704_s2, 128 }
  0x26   :  { %p1498_p2 = scmp.ne.s32.totalorder %s1704_s2, %s1497_s22  ;;  %p1501_p3 = scmp.lt.u32.totalorder %s1497_s22, %s1704_s2 }
  0x28   :  { %p1503_p4 = pnand %p1501_p3, %p1498_p2 }
  0x2a   :  { %1506 = shalt.err (!%p1503_p4)
}
  0x2b   :  { %s1507_s27 = scalar_lea.vmem %s43_s10, 128  ;;  %p1512_p6 = scmp.lt.s32.totalorder %s43_s10, %s43_s10 }
  0x2c   :  { %p1508_p5 = scmp.ne.s32.totalorder %s43_s10, %s1507_s27  ;;  %p1513_p7 = scmp.lt.s32.totalorder %s1507_s27, %s1507_s27 }
  0x2e   :  { %p1514_p8 = por %p1513_p7, %p1512_p6 }
  0x30   :  { %p1515_p9 = pnand %p1514_p8, %p1508_p5 }
  0x32   :  { %1518 = shalt.err (!%p1515_p9)
}
  0x33   :  { %45 = dma.hbm_to_vmem [thread:$0]  %s1704_s2, 128, %s43_s10, [#allocation6]  }
  0x34   :  { %s1576_s29 = smov [#allocation8]   ;;  %s1519_s8 = scalar_lea.hbm %s1705_s3, 8192 }
  0x35   :  { %s51_s30 = sshll.u32 %s1576_s29, 4  ;;  %p1520_p10 = scmp.ne.s32.totalorder %s1705_s3, %s1519_s8  ;;  %s52_s30 = int_to_ptr.vmem [resolvable:$true] %s51_s30 }
  0x36   :  { %p1523_p11 = scmp.lt.u32.totalorder %s1519_s8, %s1705_s3 }
  0x38   :  { %p1525_p12 = pnand %p1523_p11, %p1520_p10 }
  0x3a   :  { %1528 = shalt.err (!%p1525_p12)
}
  0x3b   :  { %s1529_s14 = scalar_lea.vmem %s52_s30, 8192  ;;  %p1534_p0 = scmp.lt.s32.totalorder %s52_s30, %s52_s30 }
  0x3c   :  { %p1530_p13 = scmp.ne.s32.totalorder %s52_s30, %s1529_s14  ;;  %p1535_p1 = scmp.lt.s32.totalorder %s1529_s14, %s1529_s14 }
  0x3e   :  { %p1536_p2 = por %p1535_p1, %p1534_p0 }
  0x40   :  { %p1537_p3 = pnand %p1536_p2, %p1530_p13 }
  0x42   :  { %1540 = shalt.err (!%p1537_p3)
}
  0x43   :  { %s1577_s2 = smov 64   ;;  %s1578_s10 = smov 4  }
  0x44   :  { %57 = dma.hbm_to_vmem [thread:$0]  %s1705_s3, 8192, %s52_s30, [#allocation9], %s1577_s2, %s1577_s2, %s1578_s10  }
  0x45   :  { %1563 = dma.done.wait [#allocation3], 128  }
  0x46   :  { %1564 = vsyncadd [#allocation3], 4294967168 }
  0x47   :  { %1565 = dma.done.wait [#allocation6], 4224  }
  0x48   :  { %1566 = vsyncadd [#allocation6], 4294963072 }
  0x49   :  { %1567 = dma.done.wait [#allocation9], 8192  }
  0x4a   :  { %1568 = vsyncadd [#allocation9], 4294959104  ;;  %v1579_v0 = vmov 0   ;;  %v75_v1 = vld [vmem:[#allocation5] sm:$0xff]  ;;  %v76_v3 = vld [vmem:[#allocation5 + $0x8] sm:$0xff]  ;;  %vm309_vm0 = vcmask 523264  }
  0x4b   :  { %345 = vmatprep.mubr.bf16.mxu0 %v1579_v0  ;;  %386 = vmatprep.mubr.bf16.mxu1 %v1579_v0  ;;  %v79_v2 = vld [vmem:[#allocation5 + $0x20] sm:$0xff]  ;;  %v80_v5 = vld [vmem:[#allocation5 + $0x28] sm:$0xff]  ;;  %v73_v31 = vld [vmem:[#allocation2] sm:$0xff] }
  0x4c   :  { %v1191_v4 = vcombine.high %v75_v1, %v79_v2  ;;  %v1190_v6 = vcombine.low %v75_v1, %v79_v2  ;;  %v83_v7 = vld [vmem:[#allocation5 + $0x40] sm:$0xff]  ;;  %v1193_v9 = vcombine.high %v76_v3, %v80_v5  ;;  %v1192_v10 = vcombine.low %v76_v3, %v80_v5  ;;  %v84_v12 = vld [vmem:[#allocation5 + $0x48] sm:$0xff]  ;;  %v77_v32 = vld [vmem:[#allocation5 + $0x10] sm:$0xff] }
  0x4d   :  { %v87_v8 = vld [vmem:[#allocation5 + $0x60] sm:$0xff]  ;;  %v88_v13 = vld [vmem:[#allocation5 + $0x68] sm:$0xff]  ;;  %v81_v33 = vld [vmem:[#allocation5 + $0x30] sm:$0xff]  ;;  %v74_v43 = vpack.c.bf16 %v73_v31, %v73_v31 }
  0x4e   :  { %v1199_v11 = vcombine.high %v83_v7, %v87_v8  ;;  %v91_v14 = vld [vmem:[#allocation5 + $0x80] sm:$0xff]  ;;  %313 = vmatprep.subr.bf16.mxu0 %v1191_v4  ;;  %v1201_v15 = vcombine.high %v84_v12, %v88_v13  ;;  %v92_v17 = vld [vmem:[#allocation5 + $0x88] sm:$0xff]  ;;  %354 = vmatprep.subr.bf16.mxu1 %v1193_v9  ;;  %v1198_v19 = vcombine.low %v83_v7, %v87_v8  ;;  %v78_v34 = vld [vmem:[#allocation5 + $0x18] sm:$0xff] }
  0x4f   :  { %v95_v16 = vld [vmem:[#allocation5 + $0xa0] sm:$0xff]  ;;  %v96_v18 = vld [vmem:[#allocation5 + $0xa8] sm:$0xff]  ;;  %314 = vmatpush1.bf16.msra.mxu0 %v1190_v6  ;;  %355 = vmatpush1.bf16.msra.mxu1 %v1192_v10  ;;  %v1200_v20 = vcombine.low %v84_v12, %v88_v13  ;;  %v82_v35 = vld [vmem:[#allocation5 + $0x38] sm:$0xff]  ;;  %v1195_v39 = vcombine.high %v77_v32, %v81_v33  ;;  %v1194_v45 = vcombine.low %v77_v32, %v81_v33 }
  0x50   :  { %315 = vmatprep.subr.bf16.mxu0 %v1199_v11  ;;  %v1207_v21 = vcombine.high %v91_v14, %v95_v16  ;;  %356 = vmatprep.subr.bf16.mxu1 %v1201_v15  ;;  %v1209_v22 = vcombine.high %v92_v17, %v96_v18  ;;  %v99_v23 = vld [vmem:[#allocation5 + $0xc0] sm:$0xff]  ;;  %v100_v25 = vld [vmem:[#allocation5 + $0xc8] sm:$0xff]  ;;  %v1206_v27 = vcombine.low %v91_v14, %v95_v16  ;;  %v85_v37 = vld [vmem:[#allocation5 + $0x50] sm:$0xff] }
  0x51   :  { %v103_v24 = vld [vmem:[#allocation5 + $0xe0] sm:$0xff]  ;;  %v104_v26 = vld [vmem:[#allocation5 + $0xe8] sm:$0xff]  ;;  %v1208_v28 = vcombine.low %v92_v17, %v96_v18  ;;  %v89_v40 = vld [vmem:[#allocation5 + $0x70] sm:$0xff]  ;;  %v1197_v41 = vcombine.high %v78_v34, %v82_v35  ;;  %v1196_v47 = vcombine.low %v78_v34, %v82_v35 }
  0x52   :  { %v1215_v29 = vcombine.high %v99_v23, %v103_v24  ;;  %v1217_v30 = vcombine.high %v100_v25, %v104_v26  ;;  %v1214_v36 = vcombine.low %v99_v23, %v103_v24  ;;  %v1216_v38 = vcombine.low %v100_v25, %v104_v26  ;;  %v86_v42 = vld [vmem:[#allocation5 + $0x58] sm:$0xff]  ;;  %v93_v46 = vld [vmem:[#allocation5 + $0x90] sm:$0xff]  ;;  %v1389_v3 = vld [vmem:[#allocation8 + $0x40] sm:$0xff]  }
  0x53   :  { %316 = vmatpush1.bf16.msra.mxu0 %v1198_v19  ;;  %357 = vmatpush1.bf16.msra.mxu1 %v1200_v20  ;;  %v90_v44 = vld [vmem:[#allocation5 + $0x78] sm:$0xff]  ;;  %v1203_v48 = vcombine.high %v85_v37, %v89_v40  ;;  %v97_v49 = vld [vmem:[#allocation5 + $0xb0] sm:$0xff]  ;;  %v1202_v53 = vcombine.low %v85_v37, %v89_v40  ;;  %v1390_v5 = vld [vmem:[#allocation8 + $0xc0] sm:$0xff]   ;;  %v109_v37 = vlaneseq }
  0x54   :  { %317 = vmatprep.subr.bf16.mxu0 %v1207_v21  ;;  %358 = vmatprep.subr.bf16.mxu1 %v1209_v22  ;;  %v1205_v50 = vcombine.high %v86_v42, %v90_v44  ;;  %v94_v51 = vld [vmem:[#allocation5 + $0x98] sm:$0xff]  ;;  %v101_v54 = vld [vmem:[#allocation5 + $0xd0] sm:$0xff]  ;;  %v1204_v55 = vcombine.low %v86_v42, %v90_v44  ;;  %v1211_v56 = vcombine.high %v93_v46, %v97_v49  ;;  %v1391_v6 = vld [vmem:[#allocation8] sm:$0xff]  }
  0x55   :  { %v98_v52 = vld [vmem:[#allocation5 + $0xb8] sm:$0xff]  ;;  %v105_v57 = vld [vmem:[#allocation5 + $0xf0] sm:$0xff]  ;;  %v1210_v61 = vcombine.low %v93_v46, %v97_v49  ;;  %v1392_v7 = vld [vmem:[#allocation8 + $0x80] sm:$0xff]  }
  0x56   :  { %v1213_v58 = vcombine.high %v94_v51, %v98_v52  ;;  %v102_v59 = vld [vmem:[#allocation5 + $0xd8] sm:$0xff]  ;;  %v1212_v62 = vcombine.low %v94_v51, %v98_v52  ;;  %v1219_v63 = vcombine.high %v101_v54, %v105_v57  ;;  %v1218_v2 = vcombine.low %v101_v54, %v105_v57  ;;  %v1394_v8 = vld [vmem:[#allocation8 + $0xc8] sm:$0xff]   ;;  %v1401_v15 = vld [vmem:[#allocation8 + $0x58] sm:$0xff]  }
  0x57   :  { %318 = vmatpush1.bf16.msra.mxu0 %v1206_v27  ;;  %359 = vmatpush1.bf16.msra.mxu1 %v1208_v28  ;;  %v106_v60 = vld [vmem:[#allocation5 + $0xf8] sm:$0xff]  ;;  %v1395_v9 = vld [vmem:[#allocation8 + $0x8] sm:$0xff]   ;;  %v1402_v16 = vld [vmem:[#allocation8 + $0xd8] sm:$0xff]  }
  0x58   :  { %319 = vmatprep.subr.bf16.mxu0 %v1215_v29  ;;  %360 = vmatprep.subr.bf16.mxu1 %v1217_v30  ;;  %v1221_v1 = vcombine.high %v102_v59, %v106_v60  ;;  %v1220_v4 = vcombine.low %v102_v59, %v106_v60  ;;  %v1396_v10 = vld [vmem:[#allocation8 + $0x88] sm:$0xff]   ;;  %v1397_v11 = vld [vmem:[#allocation8 + $0x50] sm:$0xff]   ;;  %v1403_v17 = vld [vmem:[#allocation8 + $0x18] sm:$0xff]  }
  0x59   :  { %v1398_v12 = vld [vmem:[#allocation8 + $0xd0] sm:$0xff]   ;;  %v1404_v18 = vld [vmem:[#allocation8 + $0x98] sm:$0xff]   ;;  %v1405_v19 = vld [vmem:[#allocation8 + $0x60] sm:$0xff]  }
  0x5a   :  { %v1399_v13 = vld [vmem:[#allocation8 + $0x10] sm:$0xff]   ;;  %v1406_v20 = vld [vmem:[#allocation8 + $0xe0] sm:$0xff]   ;;  %v1409_v23 = vld [vmem:[#allocation8 + $0x68] sm:$0xff]  }
  0x5b   :  { %320 = vmatpush1.bf16.msra.mxu0 %v1214_v36  ;;  %361 = vmatpush1.bf16.msra.mxu1 %v1216_v38  ;;  %v1400_v14 = vld [vmem:[#allocation8 + $0x90] sm:$0xff]   ;;  %v1407_v21 = vld [vmem:[#allocation8 + $0x20] sm:$0xff]   ;;  %v1410_v24 = vld [vmem:[#allocation8 + $0xe8] sm:$0xff]   ;;  %v1667_v38 = vshrl.u32 %v109_v37, 7 }
  0x5c   :  { %395 = vmatprep.subr.bf16.mxu0 %v1195_v39  ;;  %436 = vmatprep.subr.bf16.mxu1 %v1197_v41  ;;  %v1408_v22 = vld [vmem:[#allocation8 + $0xa0] sm:$0xff]   ;;  %v1411_v25 = vld [vmem:[#allocation8 + $0x28] sm:$0xff]   ;;  %v1413_v27 = vld [vmem:[#allocation8 + $0x70] sm:$0xff]  }
  0x5d   :  { %v1412_v26 = vld [vmem:[#allocation8 + $0xa8] sm:$0xff]   ;;  %v1414_v28 = vld [vmem:[#allocation8 + $0xf0] sm:$0xff]   ;;  %v1417_v31 = vld [vmem:[#allocation8 + $0x78] sm:$0xff]   ;;  %v111_v39 = vsub.s32 0, %v1667_v38  ;;  %v119_v41 = vsub.s32 2, %v1667_v38  ;;  %v115_v42 = vsub.s32 1, %v1667_v38 }
  0x5e   :  { %1222 = vmatmul.mubr.msk.bf16.vlgmr.msra.gmra.mrb[0].mxu0 %vm309_vm0, %v74_v43  ;;  %1223 = vmatmul.mubr.msk.bf16.vlgmr.msra.gmra.mrb[0].mxu1 %vm309_vm0, %v74_v43  ;;  %v1415_v29 = vld [vmem:[#allocation8 + $0x30] sm:$0xff]   ;;  %v1418_v32 = vld [vmem:[#allocation8 + $0xf8] sm:$0xff]   ;;  %v1421_v35 = vld [vmem:[#allocation8 + $0x140] sm:$0xff]  }
  0x5f   :  { %396 = vmatpush1.bf16.msra.mxu0 %v1194_v45  ;;  %437 = vmatpush1.bf16.msra.mxu1 %v1196_v47  ;;  %v1416_v30 = vld [vmem:[#allocation8 + $0xb0] sm:$0xff]   ;;  %v1419_v33 = vld [vmem:[#allocation8 + $0x38] sm:$0xff]   ;;  %v1422_v36 = vld [vmem:[#allocation8 + $0x1c0] sm:$0xff]  }
  0x60   :  { %397 = vmatprep.subr.bf16.mxu0 %v1203_v48  ;;  %438 = vmatprep.subr.bf16.mxu1 %v1205_v50  ;;  %v1420_v34 = vld [vmem:[#allocation8 + $0xb8] sm:$0xff]  }
  0x61   :  { %427 = vmatprep.mubr.bf16.mxu0 %v1579_v0  ;;  %468 = vmatprep.mubr.bf16.mxu1 %v1579_v0  ;;  %v1393_v0 = vld [vmem:[#allocation8 + $0x48] sm:$0xff]   ;;  %v1670_v40 = vld [vmem:[#allocation7] sm:$0xff] }
  0x62   :  { %v112_v44 = vrot.slane %v1670_v40, %v111_v39  ;;  %v120_v45 = vrot.slane %v1670_v40, %v119_v41  ;;  %v116_v46 = vrot.slane %v1670_v40, %v115_v42  ;;  %v135_v39 = vsub.s32 6, %v1667_v38  ;;  %v1440_v41 = vld [vmem:[#allocation8 + $0x1a0] sm:$0xff]  }
  0x63   :  { %398 = vmatpush1.bf16.msra.mxu0 %v1202_v53  ;;  %439 = vmatpush1.bf16.msra.mxu1 %v1204_v55  ;;  %v127_v42 = vsub.s32 4, %v1667_v38 }
  0x64   :  { %399 = vmatprep.subr.bf16.mxu0 %v1211_v56  ;;  %440 = vmatprep.subr.bf16.mxu1 %v1213_v58 }
  0x67   :  { %400 = vmatpush1.bf16.msra.mxu0 %v1210_v61  ;;  %441 = vmatpush1.bf16.msra.mxu1 %v1212_v62 }
  0x68   :  { %401 = vmatprep.subr.bf16.mxu0 %v1219_v63  ;;  %442 = vmatprep.subr.bf16.mxu1 %v1221_v1 }
  0x6b   :  { %402 = vmatpush1.bf16.msra.mxu0 %v1218_v2  ;;  %443 = vmatpush1.bf16.msra.mxu1 %v1220_v4 }
  0x6c   :  { %1291 = vmatprep.subr.bf16.mxu0 %v1389_v3  ;;  %1313 = vmatprep.subr.bf16.mxu1 %v1390_v5  ;;  %v1423_v3 = vld [vmem:[#allocation8 + $0x100] sm:$0xff]  }
  0x6e   :  { %1224 = vmatmul.mubr.msk.bf16.vlgmr.msra.gmra.mrb[4].mxu0 %vm309_vm0, %v74_v43  ;;  %1225 = vmatmul.mubr.msk.bf16.vlgmr.msra.gmra.mrb[4].mxu1 %vm309_vm0, %v74_v43  ;;  %v123_v43 = vsub.s32 3, %v1667_v38 }
  0x6f   :  { %1292 = vmatpush3.bf16.msra.mxu0 %v1391_v6  ;;  %1314 = vmatpush3.bf16.msra.mxu1 %v1392_v7  ;;  %v1424_v6 = vld [vmem:[#allocation8 + $0x180] sm:$0xff]   ;;  %v1425_v7 = vld [vmem:[#allocation8 + $0x148] sm:$0xff]  }
  0x70   :  { %1293 = vmatprep.subr.bf16.mxu0 %v1393_v0  ;;  %1315 = vmatprep.subr.bf16.mxu1 %v1394_v8  ;;  %v124_v47 = vrot.slane %v1670_v40, %v123_v43  ;;  %v1426_v0 = vld [vmem:[#allocation8 + $0x1c8] sm:$0xff]  }
  0x71   :  { %v1427_v8 = vld [vmem:[#allocation8 + $0x108] sm:$0xff]  }
  0x72   :  { %v1441_v43 = vld [vmem:[#allocation8 + $0x168] sm:$0xff]  }
  0x73   :  { %1294 = vmatpush3.bf16.msra.mxu0 %v1395_v9  ;;  %1316 = vmatpush3.bf16.msra.mxu1 %v1396_v10  ;;  %v131_v9 = vsub.s32 5, %v1667_v38  ;;  %v1428_v10 = vld [vmem:[#allocation8 + $0x188] sm:$0xff]  }
  0x74   :  { %1295 = vmatprep.subr.bf16.mxu0 %v1397_v11  ;;  %1317 = vmatprep.subr.bf16.mxu1 %v1398_v12  ;;  %v1429_v11 = vld [vmem:[#allocation8 + $0x150] sm:$0xff]   ;;  %v139_v12 = vsub.s32 7, %v1667_v38 }
  0x77   :  { %1296 = vmatpush3.bf16.msra.mxu0 %v1399_v13  ;;  %1318 = vmatpush3.bf16.msra.mxu1 %v1400_v14  ;;  %v1430_v13 = vld [vmem:[#allocation8 + $0x1d0] sm:$0xff]  }
  0x78   :  { %1297 = vmatprep.subr.bf16.mxu0 %v1401_v15  ;;  %1319 = vmatprep.subr.bf16.mxu1 %v1402_v16  ;;  %v1431_v14 = vld [vmem:[#allocation8 + $0x110] sm:$0xff]   ;;  %v132_v15 = vrot.slane %v1670_v40, %v131_v9 }
  0x79   :  { %v1432_v16 = vld [vmem:[#allocation8 + $0x190] sm:$0xff]  }
  0x7b   :  { %1298 = vmatpush3.bf16.msra.mxu0 %v1403_v17  ;;  %1320 = vmatpush3.bf16.msra.mxu1 %v1404_v18  ;;  %v1433_v17 = vld [vmem:[#allocation8 + $0x158] sm:$0xff]   ;;  %v140_v18 = vrot.slane %v1670_v40, %v139_v12 }
  0x7c   :  { %1299 = vmatprep.subr.bf16.mxu0 %v1405_v19  ;;  %1321 = vmatprep.subr.bf16.mxu1 %v1406_v20  ;;  %v1434_v19 = vld [vmem:[#allocation8 + $0x1d8] sm:$0xff]  }
  0x7f   :  { %1300 = vmatpush3.bf16.msra.mxu0 %v1407_v21  ;;  %1322 = vmatpush3.bf16.msra.mxu1 %v1408_v22 }
  0x80   :  { %1301 = vmatprep.subr.bf16.mxu0 %v1409_v23  ;;  %1323 = vmatprep.subr.bf16.mxu1 %v1410_v24  ;;  %v1435_v23 = vld [vmem:[#allocation8 + $0x118] sm:$0xff]  }
  0x83   :  { %1302 = vmatpush3.bf16.msra.mxu0 %v1411_v25  ;;  %1324 = vmatpush3.bf16.msra.mxu1 %v1412_v26 }
  0x84   :  { %1303 = vmatprep.subr.bf16.mxu0 %v1413_v27  ;;  %1325 = vmatprep.subr.bf16.mxu1 %v1414_v28  ;;  %v1436_v27 = vld [vmem:[#allocation8 + $0x198] sm:$0xff]   ;;  %v1437_v28 = vld [vmem:[#allocation8 + $0x160] sm:$0xff]  }
  0x87   :  { %1304 = vmatpush3.bf16.msra.mxu0 %v1415_v29  ;;  %1326 = vmatpush3.bf16.msra.mxu1 %v1416_v30 }
  0x88   :  { %1305 = vmatprep.subr.bf16.mxu0 %v1417_v31  ;;  %1327 = vmatprep.subr.bf16.mxu1 %v1418_v32  ;;  %v1438_v32 = vld [vmem:[#allocation8 + $0x1e0] sm:$0xff]  }
  0x8b   :  { %1306 = vmatpush3.bf16.msra.mxu0 %v1419_v33  ;;  %1328 = vmatpush3.bf16.msra.mxu1 %v1420_v34 }
  0x8c   :  { %1335 = vmatprep.subr.bf16.mxu0 %v1421_v35  ;;  %1357 = vmatprep.subr.bf16.mxu1 %v1422_v36  ;;  %v1439_v36 = vld [vmem:[#allocation8 + $0x120] sm:$0xff]  }
 0x131   :  { %v347_v48 = vpop.f32.mrb[0].mxu0  ;;  %v388_v50 = vpop.f32.mrb[0].mxu1 }
 0x132   :  { %v348_v49 = vadd.f32 %v347_v48, %v112_v44  ;;  %v349_v51 = vpop.f32.mrb[1].mxu0  ;;  %v389_v52 = vadd.f32 %v388_v50, %v120_v45  ;;  %v390_v54 = vpop.f32.mrb[1].mxu1  ;;  %v1442_v45 = vld [vmem:[#allocation8 + $0x1e8] sm:$0xff]   ;;  %v128_v48 = vrot.slane %v1670_v40, %v127_v42  ;;  %v1445_v50 = vld [vmem:[#allocation8 + $0x170] sm:$0xff]  }
 0x133   :  { %v350_v53 = vadd.f32 %v349_v51, %v116_v46  ;;  %v351_v55 = vpop.f32.mrb[2].mxu0  ;;  %v391_v57 = vadd.f32 %v390_v54, %v124_v47  ;;  %v392_v58 = vpop.f32.mrb[2].mxu1  ;;  %v1443_v46 = vld [vmem:[#allocation8 + $0x128] sm:$0xff]   ;;  %v136_v47 = vrot.slane %v1670_v40, %v135_v39  ;;  %v1446_v51 = vld [vmem:[#allocation8 + $0x1f0] sm:$0xff]   ;;  %v1452_v40 = vld [vmem:[#allocation8 + $0x1b8] sm:$0xff]  }
 0x134   :  { %v477_v56 = vmax.f32 %v348_v49, 0.0  ;;  %v352_v59 = vpop.f32.mrb[3].mxu0  ;;  %v479_v60 = vmax.f32 %v389_v52, 0.0  ;;  %v393_v62 = vpop.f32.mrb[3].mxu1  ;;  %v1444_v49 = vld [vmem:[#allocation8 + $0x1a8] sm:$0xff]   ;;  %v1447_v52 = vld [vmem:[#allocation8 + $0x130] sm:$0xff]  }
 0x135   :  { %v478_v61 = vmax.f32 %v350_v53, 0.0  ;;  %v480_v63 = vmax.f32 %v391_v57, 0.0  ;;  %v1448_v54 = vld [vmem:[#allocation8 + $0x1b0] sm:$0xff]   ;;  %v1449_v55 = vld [vmem:[#allocation8 + $0x178] sm:$0xff]  }
 0x136   :  { %v487_v1 = vpack.c.bf16 %v479_v60, %v479_v60  ;;  %v485_v4 = vpack.c.bf16 %v477_v56, %v477_v56  ;;  %v1450_v56 = vld [vmem:[#allocation8 + $0x1f8] sm:$0xff]  }
 0x137   :  { %v486_v2 = vpack.c.bf16 %v478_v61, %v478_v61  ;;  %v488_v5 = vpack.c.bf16 %v480_v63, %v480_v63  ;;  %v1451_v58 = vld [vmem:[#allocation8 + $0x138] sm:$0xff]  }
 0x139   :  { %1044 = vmatprep.mubr.bf16.mxu0 %v486_v2  ;;  %1084 = vmatprep.mubr.bf16.mxu1 %v488_v5 }
 0x13a   :  { %1045 = vmatmul.mubr.bf16.vlgmr.msra.gmra.mrb[8].mxu0 %v485_v4  ;;  %1085 = vmatmul.mubr.bf16.vlgmr.msra.gmra.mrb[8].mxu1 %v487_v1  ;;  %v1226_v1 = vld [vmem:[%s1706_s4] ss:$0 sm:$0xff]  ;;  %s1580_s4 = smov [#allocation10]  }
 0x13b   :  { %1336 = vmatpush3.bf16.msra.mxu0 %v1423_v3  ;;  %1358 = vmatpush3.bf16.msra.mxu1 %v1424_v6  ;;  %s1179_s1 = sshll.u32 %s1580_s4, 4  ;;  %s1180_s1 = int_to_ptr.vmem [resolvable:$true] %s1179_s1 }
 0x13c   :  { %1337 = vmatprep.subr.bf16.mxu0 %v1425_v7  ;;  %1359 = vmatprep.subr.bf16.mxu1 %v1426_v0  ;;  %s1541_s18 = scalar_lea.vmem %s1180_s1, 128  ;;  %p1546_p5 = scmp.lt.s32.totalorder %s1180_s1, %s1180_s1 }
 0x13d   :  { %p1542_p4 = scmp.ne.s32.totalorder %s1180_s1, %s1541_s18  ;;  %p1547_p6 = scmp.lt.s32.totalorder %s1541_s18, %s1541_s18 }
 0x13f   :  { %1338 = vmatpush3.bf16.msra.mxu0 %v1427_v8  ;;  %1360 = vmatpush3.bf16.msra.mxu1 %v1428_v10  ;;  %p1548_p7 = por %p1547_p6, %p1546_p5 }
 0x140   :  { %1339 = vmatprep.subr.bf16.mxu0 %v1429_v11  ;;  %1361 = vmatprep.subr.bf16.mxu1 %v1430_v13 }
 0x141   :  { %v429_v20 = vpop.f32.mrb[4].mxu0  ;;  %v470_v22 = vpop.f32.mrb[4].mxu1  ;;  %p1549_p8 = pnand %p1548_p7, %p1542_p4 }
 0x142   :  { %v431_v21 = vpop.f32.mrb[5].mxu0  ;;  %v472_v26 = vpop.f32.mrb[5].mxu1  ;;  %v471_v38 = vadd.f32 %v470_v22, %v136_v47  ;;  %v430_v53 = vadd.f32 %v429_v20, %v128_v48 }
 0x143   :  { %1340 = vmatpush3.bf16.msra.mxu0 %v1431_v14  ;;  %v432_v24 = vadd.f32 %v431_v21, %v132_v15  ;;  %v433_v25 = vpop.f32.mrb[6].mxu0  ;;  %1362 = vmatpush3.bf16.msra.mxu1 %v1432_v16  ;;  %v473_v30 = vadd.f32 %v472_v26, %v140_v18  ;;  %v474_v31 = vpop.f32.mrb[6].mxu1 }
 0x144   :  { %1341 = vmatprep.subr.bf16.mxu0 %v1433_v17  ;;  %v434_v29 = vpop.f32.mrb[7].mxu0  ;;  %1363 = vmatprep.subr.bf16.mxu1 %v1434_v19  ;;  %v475_v34 = vpop.f32.mrb[7].mxu1  ;;  %v483_v57 = vmax.f32 %v471_v38, 0.0  ;;  %v481_v59 = vmax.f32 %v430_v53, 0.0 }
 0x145   :  { %v482_v33 = vmax.f32 %v432_v24, 0.0  ;;  %v484_v35 = vmax.f32 %v473_v30, 0.0 }
 0x146   :  { %v491_v60 = vpack.c.bf16 %v483_v57, %v483_v57  ;;  %v489_v61 = vpack.c.bf16 %v481_v59, %v481_v59 }
 0x147   :  { %1342 = vmatpush3.bf16.msra.mxu0 %v1435_v23  ;;  %v490_v37 = vpack.c.bf16 %v482_v33, %v482_v33  ;;  %1364 = vmatpush3.bf16.msra.mxu1 %v1436_v27  ;;  %v492_v44 = vpack.c.bf16 %v484_v35, %v484_v35 }
 0x148   :  { %1343 = vmatprep.subr.bf16.mxu0 %v1437_v28  ;;  %1365 = vmatprep.subr.bf16.mxu1 %v1438_v32 }
 0x149   :  { %1124 = vmatprep.mubr.bf16.mxu0 %v490_v37  ;;  %1164 = vmatprep.mubr.bf16.mxu1 %v492_v44 }
 0x14b   :  { %1344 = vmatpush3.bf16.msra.mxu0 %v1439_v36  ;;  %1366 = vmatpush3.bf16.msra.mxu1 %v1440_v41 }
 0x14c   :  { %1345 = vmatprep.subr.bf16.mxu0 %v1441_v43  ;;  %1367 = vmatprep.subr.bf16.mxu1 %v1442_v45 }
 0x14f   :  { %1346 = vmatpush3.bf16.msra.mxu0 %v1443_v46  ;;  %1368 = vmatpush3.bf16.msra.mxu1 %v1444_v49 }
 0x150   :  { %1347 = vmatprep.subr.bf16.mxu0 %v1445_v50  ;;  %1369 = vmatprep.subr.bf16.mxu1 %v1446_v51 }
 0x153   :  { %1348 = vmatpush3.bf16.msra.mxu0 %v1447_v52  ;;  %1370 = vmatpush3.bf16.msra.mxu1 %v1448_v54 }
 0x154   :  { %1349 = vmatprep.subr.bf16.mxu0 %v1449_v55  ;;  %1371 = vmatprep.subr.bf16.mxu1 %v1450_v56 }
 0x157   :  { %1350 = vmatpush3.bf16.msra.mxu0 %v1451_v58  ;;  %1372 = vmatpush3.bf16.msra.mxu1 %v1452_v40 }
 0x15a   :  { %1125 = vmatmul.mubr.bf16.vlgmr.msra.gmra.mrb[12].mxu0 %v489_v61  ;;  %1165 = vmatmul.mubr.bf16.vlgmr.msra.gmra.mrb[12].mxu1 %v491_v60 }
 0x20d   :  { %v1307_v62 = vpop.f32.mrb[8].mxu0  ;;  %v1329_v63 = vpop.f32.mrb[8].mxu1 }
 0x20e   :  { %v1308_v2 = vpop.f32.mrb[9].mxu0  ;;  %v1330_v4 = vpop.f32.mrb[9].mxu1 }
 0x20f   :  { %v1309_v3 = vadd.f32 %v1308_v2, %v1307_v62  ;;  %v1310_v5 = vpop.f32.mrb[10].mxu0  ;;  %v1331_v6 = vadd.f32 %v1330_v4, %v1329_v63  ;;  %v1332_v7 = vpop.f32.mrb[10].mxu1 }
 0x210   :  { %v1311_v0 = vpop.f32.mrb[11].mxu0  ;;  %v1333_v9 = vpop.f32.mrb[11].mxu1 }
 0x211   :  { %v1047_v8 = vadd.f32 %v1309_v3, %v1226_v1 }
 0x213   :  { %v1087_v10 = vadd.f32 %v1331_v6, %v1047_v8 }
 0x22d   :  { %v1351_v11 = vpop.f32.mrb[12].mxu0  ;;  %v1373_v12 = vpop.f32.mrb[12].mxu1 }
 0x22e   :  { %v1352_v13 = vpop.f32.mrb[13].mxu0  ;;  %v1374_v15 = vpop.f32.mrb[13].mxu1 }
 0x22f   :  { %v1353_v14 = vadd.f32 %v1352_v13, %v1351_v11  ;;  %v1354_v16 = vpop.f32.mrb[14].mxu0  ;;  %v1375_v17 = vadd.f32 %v1374_v15, %v1373_v12  ;;  %v1376_v18 = vpop.f32.mrb[14].mxu1 }
 0x230   :  { %v1355_v19 = vpop.f32.mrb[15].mxu0  ;;  %v1377_v21 = vpop.f32.mrb[15].mxu1 }
 0x231   :  { %v1127_v20 = vadd.f32 %v1353_v14, %v1087_v10 }
 0x233   :  { %v1167_v22 = vadd.f32 %v1375_v17, %v1127_v20 }
 0x235   :  { %1172 = vst [vmem:[#allocation10] sm:$0xff] %v1167_v22 }
 0x236   :  { %1552 = shalt.err (!%p1549_p8)
}
 0x237   :  { %s1553_s21 = scalar_lea.hbm %s1707_s5, 128 }
 0x238   :  { %p1554_p9 = scmp.ne.s32.totalorder %s1707_s5, %s1553_s21  ;;  %p1557_p10 = scmp.lt.u32.totalorder %s1553_s21, %s1707_s5 }
 0x23a   :  { %p1559_p11 = pnand %p1557_p10, %p1554_p9 }
 0x23c   :  { %1562 = shalt.err (!%p1559_p11)
}
 0x23d   :  { %1182 = dma.vmem_to_hbm [thread:$0]  %s1180_s1, 128, %s1707_s5, [#allocation4]  }
 0x23e   :  { %1569 = dma.done.wait [#allocation4], 128  }
 0x23f   :  { %1570 = vsyncadd [#allocation4], 4294967168 }
 0x240   :  { %1186 = vsyncpa [#allocation3], 1 }
 0x241   :  { %1187 = vsyncpa [#allocation6], 1 }
 0x242   :  { %1188 = vsyncpa [#allocation9], 1 }
 0x243   :  { %1189 = vsyncpa [#allocation4], 1 }

</bundles_post_ra>
